<compile_context>
chip_gen: v6e
topology: v6e:2x2x1
jax: 0.10.0
libtpu: 0.0.40
codegen_flags: <defaults>
</compile_context>

<pallas_src>
import functools

import jax
import jax.numpy as jnp
from jax.experimental import pallas as pl
from jax.experimental.pallas import tpu as pltpu


def _round_up(x, m):
    return ((x + m - 1) // m) * m


def _vmem_budget_bytes():
    # Leave ~25% headroom for compiler scratch; never assume more VMEM than the chip
    # actually has (v7x: 64 MiB/TC, v5e/v6e: 128 MiB).
    try:
        cap = int(pltpu.get_tpu_info().vmem_capacity_bytes)
    except Exception:  # pragma: no cover - conservative fallback
        cap = 64 * 1024 * 1024
    return int(cap * 3 // 4)


# ---------------------------------------------------------------------------
# Path 1: fully fused single-launch kernel (small graphs, everything in VMEM)
# ---------------------------------------------------------------------------
def _fused_graphsage_kernel(a_ref, h0_ref, w_ref, b_ref, o_ref, h_scr, *, n_layers, f_pad):
    # a_ref : [N, N]            bf16 row-normalized adjacency
    # h0_ref: [N, Fpad]         f32 zero-padded input features
    # w_ref : [L, Fpad, 2*Fpad] bf16 stacked weights [Ws^T | Wn^T]
    # b_ref : [L, 1, Fpad]      f32 fused bias (b_self + b_neigh)
    # o_ref : [N, Fpad]         f32 padded logits
    # h_scr : [N, Fpad]         f32 VMEM scratch (ping-pong H to bound live ranges)
    h_scr[...] = h0_ref[...]
    for l in range(n_layers):  # static unroll; H never leaves VMEM
        # Stacked MXU push (bf16 operands, f32 accumulation): K = Fpad, N = 2*Fpad.
        z = jnp.dot(h_scr[...].astype(jnp.bfloat16), w_ref[l],
                    preferred_element_type=jnp.float32)
        z_self = z[:, :f_pad]
        z_neigh = z[:, f_pad:].astype(jnp.bfloat16)
        # Project-then-aggregate: A @ (H Wn^T) == (A @ H) Wn^T.  Bias/ReLU in f32.
        out = z_self + jnp.dot(a_ref[...], z_neigh,
                               preferred_element_type=jnp.float32) + b_ref[l]
        if l != n_layers - 1:
            out = jnp.maximum(out, 0.0)
        h_scr[...] = out
    o_ref[...] = h_scr[...]


def graphsage_forward_pallas_fused(a_bf16, h0, w_packed, b_packed, n_classes):
    """Fully fused GraphSAGE forward: one pallas_call, all layers, all data resident."""
    n, f_pad = h0.shape
    n_layers = w_packed.shape[0]

    kernel = functools.partial(_fused_graphsage_kernel, n_layers=n_layers, f_pad=f_pad)
    flops = 2 * n_layers * (n * f_pad * 2 * f_pad + n * n * f_pad)
    bytes_accessed = (2 * n * n                      # bf16 adjacency
                      + 4 * n * f_pad * 2            # h0 in + logits out (f32)
                      + 2 * n_layers * f_pad * 2 * f_pad  # bf16 weights
                      + 4 * n_layers * f_pad)        # f32 biases

    vmem_spec = pl.BlockSpec(memory_space=pltpu.MemorySpace.VMEM)
    out_padded = pl.pallas_call(
        kernel,
        out_shape=jax.ShapeDtypeStruct((n, f_pad), jnp.float32),
        in_specs=[vmem_spec, vmem_spec, vmem_spec, vmem_spec],
        out_specs=vmem_spec,
        scratch_shapes=[pltpu.VMEM((n, f_pad), jnp.float32)],
        compiler_params=pltpu.CompilerParams(vmem_limit_bytes=_vmem_budget_bytes()),
        cost_estimate=pl.CostEstimate(flops=flops, transcendentals=0,
                                      bytes_accessed=bytes_accessed),
    )(a_bf16, h0, w_packed, b_packed)
    return out_padded[:, :n_classes]


# ---------------------------------------------------------------------------
# Path 2: per-layer, row x K tiled streaming version (large graphs)
# ---------------------------------------------------------------------------
def _proj_kernel(h_ref, w_ref, zs_ref, zn_ref, *, f_pad):
    z = jnp.dot(h_ref[...].astype(jnp.bfloat16), w_ref[...],
                preferred_element_type=jnp.float32)
    zs_ref[...] = z[:, :f_pad]
    zn_ref[...] = z[:, f_pad:].astype(jnp.bfloat16)


def _projection_call(h, w_l, f_pad, tile_m):
    n = h.shape[0]
    kernel = functools.partial(_proj_kernel, f_pad=f_pad)
    return pl.pallas_call(
        kernel,
        out_shape=(jax.ShapeDtypeStruct((n, f_pad), jnp.float32),
                   jax.ShapeDtypeStruct((n, f_pad), jnp.bfloat16)),
        grid=(n // tile_m,),
        in_specs=[pl.BlockSpec((tile_m, f_pad), lambda i: (i, 0)),
                  pl.BlockSpec((f_pad, 2 * f_pad), lambda i: (0, 0))],
        out_specs=(pl.BlockSpec((tile_m, f_pad), lambda i: (i, 0)),
                   pl.BlockSpec((tile_m, f_pad), lambda i: (i, 0))),
        compiler_params=pltpu.CompilerParams(dimension_semantics=("parallel",)),
    )(h, w_l)


def _agg_kernel(a_ref, zn_ref, zs_ref, b_ref, o_ref, acc_ref, *, apply_relu):
    k = pl.program_id(1)

    @pl.when(k == 0)
    def _():
        acc_ref[...] = jnp.zeros_like(acc_ref)

    acc_ref[...] += jnp.dot(a_ref[...], zn_ref[...], preferred_element_type=jnp.float32)

    @pl.when(k == pl.num_programs(1) - 1)
    def _():
        out = acc_ref[...] + zs_ref[...] + b_ref[...]
        if apply_relu:
            out = jnp.maximum(out, 0.0)
        o_ref[...] = out


def _aggregation_call(a_bf16, z_neigh, z_self, b_l, apply_relu, f_pad, tile_m, tile_k):
    n = a_bf16.shape[0]
    kernel = functools.partial(_agg_kernel, apply_relu=apply_relu)
    flops = 2 * n * n * f_pad
    bytes_accessed = 2 * n * n + 2 * n * f_pad + 4 * n * f_pad + 4 * n * f_pad + 4 * f_pad
    return pl.pallas_call(
        kernel,
        out_shape=jax.ShapeDtypeStruct((n, f_pad), jnp.float32),
        grid=(n // tile_m, n // tile_k),
        in_specs=[
            pl.BlockSpec((tile_m, tile_k), lambda i, k: (i, k)),   # A tile (streamed)
            pl.BlockSpec((tile_k, f_pad), lambda i, k: (k, 0)),    # Z_neigh K-block
            pl.BlockSpec((tile_m, f_pad), lambda i, k: (i, 0)),    # Z_self row-block
            pl.BlockSpec((1, f_pad), lambda i, k: (0, 0)),         # fused bias
        ],
        out_specs=pl.BlockSpec((tile_m, f_pad), lambda i, k: (i, 0)),
        scratch_shapes=[pltpu.VMEM((tile_m, f_pad), jnp.float32)],
        compiler_params=pltpu.CompilerParams(
            dimension_semantics=("parallel", "arbitrary")),
        cost_estimate=pl.CostEstimate(flops=flops, transcendentals=0,
                                      bytes_accessed=bytes_accessed),
    )(a_bf16, z_neigh, z_self, b_l)


def graphsage_forward_pallas_tiled(a_bf16, h0, w_packed, b_packed, n_classes,
                                   *, tile_m=None, tile_k=None):
    """Per-layer GraphSAGE forward: projection + row x K tiled aggregation per layer."""
    n, f_pad = h0.shape
    n_layers = w_packed.shape[0]
    if tile_m is None:
        # 256-sized tiles fill v6e/v7x's 256x256 MXU; use tile_m=tile_k=128 on v5e.
        tile_m = 256 if (n % 256 == 0 and n >= 512) else 128
    if tile_k is None:
        tile_k = tile_m
    assert n % tile_m == 0 and n % tile_k == 0, "pad N to a multiple of the tile size"

    h = h0
    for l in range(n_layers):
        z_self, z_neigh = _projection_call(h, w_packed[l], f_pad, tile_m)
        h = _aggregation_call(a_bf16, z_neigh, z_self, b_packed[l],
                              apply_relu=(l != n_layers - 1),
                              f_pad=f_pad, tile_m=tile_m, tile_k=tile_k)
    return h[:, :n_classes]


# ---------------------------------------------------------------------------
# Parameter init (torch-style shapes) and one-time packing for the kernels
# ---------------------------------------------------------------------------
def init_graphsage_params(key, in_feats, n_hidden, n_classes, n_layers):
    """Deterministic parameter init mirroring the PyTorch module's layer shapes."""
    dims = [in_feats] + [n_hidden] * n_layers + [n_classes]
    params = []
    for fin, fout in zip(dims[:-1], dims[1:]):
        key, k1, k2, k3, k4 = jax.random.split(key, 5)
        scale = 1.0 / jnp.sqrt(jnp.float32(fin))
        params.append(
            dict(
                w_self=jax.random.uniform(k1, (fout, fin), jnp.float32, -scale, scale),
                b_self=jax.random.uniform(k2, (fout,), jnp.float32, -scale, scale),
                w_neigh=jax.random.uniform(k3, (fout, fin), jnp.float32, -scale, scale),
                b_neigh=jax.random.uniform(k4, (fout,), jnp.float32, -scale, scale),
            )
        )
    return params


def pack_graphsage_params(params, f_pad):
    """One-time packing: transpose, zero-pad to Fpad, stack [Ws^T | Wn^T] (bf16), fuse biases."""
    w_list, b_list = [], []
    for p in params:
        fout, fin = p["w_self"].shape
        ws = jnp.zeros((f_pad, f_pad), jnp.float32).at[:fin, :fout].set(p["w_self"].T)
        wn = jnp.zeros((f_pad, f_pad), jnp.float32).at[:fin, :fout].set(p["w_neigh"].T)
        w_list.append(jnp.concatenate([ws, wn], axis=1))                   # [Fpad, 2*Fpad]
        b = jnp.zeros((1, f_pad), jnp.float32).at[0, :fout].set(p["b_self"] + p["b_neigh"])
        b_list.append(b)
    w = jnp.stack(w_list).astype(jnp.bfloat16)     # [L, Fpad, 2*Fpad]  bf16 MXU operand
    b = jnp.stack(b_list)                          # [L, 1, Fpad]       f32 (VPU adds stay f32)
    return w, b


def pack_features(features, f_pad):
    """One-time zero-padding of features to the lane-aligned width (not per forward)."""
    n, fin = features.shape
    return jnp.zeros((n, f_pad), jnp.float32).at[:, :fin].set(features)


# ---------------------------------------------------------------------------
# Reference in plain JAX (f32 weights) for the sanity check
# ---------------------------------------------------------------------------
def graphsage_reference(a_norm, features, params):
    h = features
    n_total = len(params)
    for li, p in enumerate(params):
        h_neigh = a_norm @ h
        out = h @ p["w_self"].T + p["b_self"] + h_neigh @ p["w_neigh"].T + p["b_neigh"]
        if li != n_total - 1:
            out = jnp.maximum(out, 0.0)
        h = out
    return h


if __name__ == "__main__":
    # 32 input feats, 64 hidden, 16 classes, n_layers=2 -> three SAGEConv layers
    # (32->64, 64->64, 64->16), same as the PyTorch module.
    IN_FEATS, N_HIDDEN, N_CLASSES, N_LAYERS = 32, 64, 16, 2
    F_PAD = _round_up(max(IN_FEATS, N_HIDDEN, N_CLASSES), 128)

    key = jax.random.PRNGKey(0)
    key, k_param = jax.random.split(key)
    params = init_graphsage_params(k_param, IN_FEATS, N_HIDDEN, N_CLASSES, N_LAYERS)
    w_packed, b_packed = pack_graphsage_params(params, F_PAD)
    w_packed = jax.block_until_ready(w_packed)

    def build_graph(k, n, density=0.05):
        k_adj, k_feat = jax.random.split(k)
        adj = (jax.random.uniform(k_adj, (n, n)) < density).astype(jnp.float32)
        adj = adj.at[jnp.arange(n), jnp.arange(n)].set(0.0)  # no self loops (DGL mean agg)
        deg = jnp.maximum(adj.sum(axis=1, keepdims=True), 1.0)
        a_norm = adj / deg
        feats = jax.random.normal(k_feat, (n, IN_FEATS), jnp.float32)
        return a_norm, feats

    # --- Small graph (N=128): fully fused single-launch kernel -------------------------
    key, k_small = jax.random.split(key)
    a_small, feat_small = build_graph(k_small, 128)
    h0_small = pack_features(feat_small, F_PAD)
    out_small = graphsage_forward_pallas_fused(
        a_small.astype(jnp.bfloat16), h0_small, w_packed, b_packed, N_CLASSES)
    out_small = jax.block_until_ready(out_small)
    ref_small = graphsage_reference(a_small, feat_small, params)
    assert out_small.shape == (128, N_CLASSES)
    assert jnp.allclose(out_small, ref_small, atol=5e-2, rtol=5e-2), float(
        jnp.max(jnp.abs(out_small - ref_small)))

    # --- Larger graph (N=512): per-layer, row x K tiled streaming version --------------
    key, k_big = jax.random.split(key)
    a_big, feat_big = build_graph(k_big, 512)
    h0_big = pack_features(feat_big, F_PAD)
    out_big = graphsage_forward_pallas_tiled(
        a_big.astype(jnp.bfloat16), h0_big, w_packed, b_packed, N_CLASSES)
    out_big = jax.block_until_ready(out_big)
    ref_big = graphsage_reference(a_big, feat_big, params)
    assert out_big.shape == (512, N_CLASSES)
    assert jnp.allclose(out_big, ref_big, atol=5e-2, rtol=5e-2), float(
        jnp.max(jnp.abs(out_big - ref_big)))

    print("KERNEL_OK")
</pallas_src>

<mosaic_0001>
module attributes {stable_mosaic.version = 11 : i64} {
  func.func @_fused_graphsage_kernel(%arg0: memref<128x128xbf16, #tpu.memory_space<vmem>>, %arg1: memref<128x128xf32, #tpu.memory_space<vmem>>, %arg2: memref<3x128x256xbf16, #tpu.memory_space<vmem>>, %arg3: memref<3x1x128xf32, #tpu.memory_space<vmem>>, %arg4: memref<128x128xf32, #tpu.memory_space<vmem>>, %arg5: memref<128x128xf32, #tpu.memory_space<vmem>>) attributes {dimension_semantics = [], scalar_prefetch = 0 : i64, scratch_operands = 1 : i64, tpu.core_type = #tpu.core_type<tc>} {
    %c0 = arith.constant 0 : index
    %c0_0 = arith.constant 0 : index
    %0 = vector.load %arg1[%c0, %c0_0] : memref<128x128xf32, #tpu.memory_space<vmem>>, vector<128x128xf32>
    %c0_1 = arith.constant 0 : index
    %c0_2 = arith.constant 0 : index
    %1 = vector.load %arg5[%c0_1, %c0_2] : memref<128x128xf32, #tpu.memory_space<vmem>>, vector<128x128xf32>
    tpu.vector_store %arg5[%c0_1, %c0_2], %0 {strides = array<i32>} : memref<128x128xf32, #tpu.memory_space<vmem>>, vector<128x128xf32>,
    %c0_3 = arith.constant 0 : index
    %c0_4 = arith.constant 0 : index
    %2 = vector.load %arg5[%c0_3, %c0_4] : memref<128x128xf32, #tpu.memory_space<vmem>>, vector<128x128xf32>
    %3 = arith.truncf %2 : vector<128x128xf32> to vector<128x128xbf16>
    %c0_5 = arith.constant 0 : index
    %c0_6 = arith.constant 0 : index
    %c0_7 = arith.constant 0 : index
    %4 = vector.load %arg2[%c0_5, %c0_6, %c0_7] : memref<3x128x256xbf16, #tpu.memory_space<vmem>>, vector<1x128x256xbf16>
    %5 = vector.shape_cast %4 : vector<1x128x256xbf16> to vector<128x256xbf16>
    %cst = arith.constant dense<0.000000e+00> : vector<128x256xf32>
    %6 = tpu.matmul %3, %5, %cst {dimension_numbers = #tpu.dot_dimension_numbers<[1], [0], [0], [1], [0, 0, 1, 1], [], []>} : vector<128x128xbf16>, vector<128x256xbf16>, vector<128x256xf32> -> vector<128x256xf32>
    %7 = vector.extract_strided_slice %6 {offsets = [0, 0], sizes = [128, 128], strides = [1, 1]} : vector<128x256xf32> to vector<128x128xf32>
    %8 = vector.extract_strided_slice %6 {offsets = [0, 128], sizes = [128, 128], strides = [1, 1]} : vector<128x256xf32> to vector<128x128xf32>
    %9 = arith.truncf %8 : vector<128x128xf32> to vector<128x128xbf16>
    %c0_8 = arith.constant 0 : index
    %c0_9 = arith.constant 0 : index
    %10 = vector.load %arg0[%c0_8, %c0_9] : memref<128x128xbf16, #tpu.memory_space<vmem>>, vector<128x128xbf16>
    %cst_10 = arith.constant dense<0.000000e+00> : vector<128x128xf32>
    %11 = tpu.matmul %10, %9, %cst_10 {dimension_numbers = #tpu.dot_dimension_numbers<[1], [0], [0], [1], [0, 0, 1, 1], [], []>} : vector<128x128xbf16>, vector<128x128xbf16>, vector<128x128xf32> -> vector<128x128xf32>
    %12 = arith.addf %7, %11 : vector<128x128xf32>
    %c0_11 = arith.constant 0 : index
    %c0_12 = arith.constant 0 : index
    %c0_13 = arith.constant 0 : index
    %13 = vector.load %arg3[%c0_11, %c0_12, %c0_13] : memref<3x1x128xf32, #tpu.memory_space<vmem>>, vector<1x1x128xf32>
    %14 = vector.shape_cast %13 : vector<1x1x128xf32> to vector<1x128xf32>
    %15 = vector.broadcast %14 : vector<1x128xf32> to vector<128x128xf32>
    %16 = arith.addf %12, %15 : vector<128x128xf32>
    %cst_14 = arith.constant 0.000000e+00 : f32
    %17 = vector.broadcast %cst_14 : f32 to vector<128x128xf32>
    %18 = arith.maximumf %16, %17 : vector<128x128xf32>
    %c0_15 = arith.constant 0 : index
    %c0_16 = arith.constant 0 : index
    %19 = vector.load %arg5[%c0_15, %c0_16] : memref<128x128xf32, #tpu.memory_space<vmem>>, vector<128x128xf32>
    tpu.vector_store %arg5[%c0_15, %c0_16], %18 {strides = array<i32>} : memref<128x128xf32, #tpu.memory_space<vmem>>, vector<128x128xf32>,
    %c0_17 = arith.constant 0 : index
    %c0_18 = arith.constant 0 : index
    %20 = vector.load %arg5[%c0_17, %c0_18] : memref<128x128xf32, #tpu.memory_space<vmem>>, vector<128x128xf32>
    %21 = arith.truncf %20 : vector<128x128xf32> to vector<128x128xbf16>
    %c1 = arith.constant 1 : index
    %c0_19 = arith.constant 0 : index
    %c0_20 = arith.constant 0 : index
    %22 = vector.load %arg2[%c1, %c0_19, %c0_20] : memref<3x128x256xbf16, #tpu.memory_space<vmem>>, vector<1x128x256xbf16>
    %23 = vector.shape_cast %22 : vector<1x128x256xbf16> to vector<128x256xbf16>
    %cst_21 = arith.constant dense<0.000000e+00> : vector<128x256xf32>
    %24 = tpu.matmul %21, %23, %cst_21 {dimension_numbers = #tpu.dot_dimension_numbers<[1], [0], [0], [1], [0, 0, 1, 1], [], []>} : vector<128x128xbf16>, vector<128x256xbf16>, vector<128x256xf32> -> vector<128x256xf32>
    %25 = vector.extract_strided_slice %24 {offsets = [0, 0], sizes = [128, 128], strides = [1, 1]} : vector<128x256xf32> to vector<128x128xf32>
    %26 = vector.extract_strided_slice %24 {offsets = [0, 128], sizes = [128, 128], strides = [1, 1]} : vector<128x256xf32> to vector<128x128xf32>
    %27 = arith.truncf %26 : vector<128x128xf32> to vector<128x128xbf16>
    %c0_22 = arith.constant 0 : index
    %c0_23 = arith.constant 0 : index
    %28 = vector.load %arg0[%c0_22, %c0_23] : memref<128x128xbf16, #tpu.memory_space<vmem>>, vector<128x128xbf16>
    %cst_24 = arith.constant dense<0.000000e+00> : vector<128x128xf32>
    %29 = tpu.matmul %28, %27, %cst_24 {dimension_numbers = #tpu.dot_dimension_numbers<[1], [0], [0], [1], [0, 0, 1, 1], [], []>} : vector<128x128xbf16>, vector<128x128xbf16>, vector<128x128xf32> -> vector<128x128xf32>
    %30 = arith.addf %25, %29 : vector<128x128xf32>
    %c1_25 = arith.constant 1 : index
    %c0_26 = arith.constant 0 : index
    %c0_27 = arith.constant 0 : index
    %31 = vector.load %arg3[%c1_25, %c0_26, %c0_27] : memref<3x1x128xf32, #tpu.memory_space<vmem>>, vector<1x1x128xf32>
    %32 = vector.shape_cast %31 : vector<1x1x128xf32> to vector<1x128xf32>
    %33 = vector.broadcast %32 : vector<1x128xf32> to vector<128x128xf32>
    %34 = arith.addf %30, %33 : vector<128x128xf32>
    %cst_28 = arith.constant 0.000000e+00 : f32
    %35 = vector.broadcast %cst_28 : f32 to vector<128x128xf32>
    %36 = arith.maximumf %34, %35 : vector<128x128xf32>
    %c0_29 = arith.constant 0 : index
    %c0_30 = arith.constant 0 : index
    %37 = vector.load %arg5[%c0_29, %c0_30] : memref<128x128xf32, #tpu.memory_space<vmem>>, vector<128x128xf32>
    tpu.vector_store %arg5[%c0_29, %c0_30], %36 {strides = array<i32>} : memref<128x128xf32, #tpu.memory_space<vmem>>, vector<128x128xf32>,
    %c0_31 = arith.constant 0 : index
    %c0_32 = arith.constant 0 : index
    %38 = vector.load %arg5[%c0_31, %c0_32] : memref<128x128xf32, #tpu.memory_space<vmem>>, vector<128x128xf32>
    %39 = arith.truncf %38 : vector<128x128xf32> to vector<128x128xbf16>
    %c2 = arith.constant 2 : index
    %c0_33 = arith.constant 0 : index
    %c0_34 = arith.constant 0 : index
    %40 = vector.load %arg2[%c2, %c0_33, %c0_34] : memref<3x128x256xbf16, #tpu.memory_space<vmem>>, vector<1x128x256xbf16>
    %41 = vector.shape_cast %40 : vector<1x128x256xbf16> to vector<128x256xbf16>
    %cst_35 = arith.constant dense<0.000000e+00> : vector<128x256xf32>
    %42 = tpu.matmul %39, %41, %cst_35 {dimension_numbers = #tpu.dot_dimension_numbers<[1], [0], [0], [1], [0, 0, 1, 1], [], []>} : vector<128x128xbf16>, vector<128x256xbf16>, vector<128x256xf32> -> vector<128x256xf32>
    %43 = vector.extract_strided_slice %42 {offsets = [0, 0], sizes = [128, 128], strides = [1, 1]} : vector<128x256xf32> to vector<128x128xf32>
    %44 = vector.extract_strided_slice %42 {offsets = [0, 128], sizes = [128, 128], strides = [1, 1]} : vector<128x256xf32> to vector<128x128xf32>
    %45 = arith.truncf %44 : vector<128x128xf32> to vector<128x128xbf16>
    %c0_36 = arith.constant 0 : index
    %c0_37 = arith.constant 0 : index
    %46 = vector.load %arg0[%c0_36, %c0_37] : memref<128x128xbf16, #tpu.memory_space<vmem>>, vector<128x128xbf16>
    %cst_38 = arith.constant dense<0.000000e+00> : vector<128x128xf32>
    %47 = tpu.matmul %46, %45, %cst_38 {dimension_numbers = #tpu.dot_dimension_numbers<[1], [0], [0], [1], [0, 0, 1, 1], [], []>} : vector<128x128xbf16>, vector<128x128xbf16>, vector<128x128xf32> -> vector<128x128xf32>
    %48 = arith.addf %43, %47 : vector<128x128xf32>
    %c2_39 = arith.constant 2 : index
    %c0_40 = arith.constant 0 : index
    %c0_41 = arith.constant 0 : index
    %49 = vector.load %arg3[%c2_39, %c0_40, %c0_41] : memref<3x1x128xf32, #tpu.memory_space<vmem>>, vector<1x1x128xf32>
    %50 = vector.shape_cast %49 : vector<1x1x128xf32> to vector<1x128xf32>
    %51 = vector.broadcast %50 : vector<1x128xf32> to vector<128x128xf32>
    %52 = arith.addf %48, %51 : vector<128x128xf32>
    %c0_42 = arith.constant 0 : index
    %c0_43 = arith.constant 0 : index
    %53 = vector.load %arg5[%c0_42, %c0_43] : memref<128x128xf32, #tpu.memory_space<vmem>>, vector<128x128xf32>
    tpu.vector_store %arg5[%c0_42, %c0_43], %52 {strides = array<i32>} : memref<128x128xf32, #tpu.memory_space<vmem>>, vector<128x128xf32>,
    %c0_44 = arith.constant 0 : index
    %c0_45 = arith.constant 0 : index
    %54 = vector.load %arg5[%c0_44, %c0_45] : memref<128x128xf32, #tpu.memory_space<vmem>>, vector<128x128xf32>
    %c0_46 = arith.constant 0 : index
    %c0_47 = arith.constant 0 : index
    %55 = vector.load %arg4[%c0_46, %c0_47] : memref<128x128xf32, #tpu.memory_space<vmem>>, vector<128x128xf32>
    tpu.vector_store %arg4[%c0_46, %c0_47], %54 {strides = array<i32>} : memref<128x128xf32, #tpu.memory_space<vmem>>, vector<128x128xf32>,
    return
  }
}

</mosaic_0001>

<bundles_post_ra>
// kernel: tpu_custom_call.1
= control target key start
LH: loop header
LB: loop body
LE: loop exit
PB: predicated region body
PF: predicated region fallthrough
CT: control target
= control target key end

     0   :  { %9 = vsyncpa [#allocation4], 0  ;;  %s2247_s0 = inlined_call_operand.hbm [shape: bf16[128,128], index: 0, kind: input, shape index: {}]   ;;  %s2248_s1 = inlined_call_operand.hbm [shape: f32[128,128], index: 1, kind: input, shape index: {}]   ;;  %s2249_s2 = inlined_call_operand.hbm [shape: bf16[3,128,256], index: 2, kind: input, shape index: {}]   ;;  %s2250_s3 = inlined_call_operand.vmem [shape: f32[3,1,128], index: 3, kind: input, shape index: {}]   ;;  %s2251_s4 = inlined_call_operand.hbm [shape: f32[128,128], index: 4, kind: output, shape index: {}]  }
   0x1   :  { %10 = vsyncpa [#allocation7], 0 }
   0x2   :  { %11 = vsyncpa [#allocation5], 0  ;;  %s1961_s15 = smov [#allocation6]  }
   0x3   :  { %s29_s16 = sshll.u32 %s1961_s15, 4  ;;  %s30_s16 = int_to_ptr.vmem [resolvable:$true] %s29_s16 }
   0x4   :  { %s1883_s17 = scalar_lea.vmem %s30_s16, 2048  ;;  %p1888_p1 = scmp.lt.s32.totalorder %s30_s16, %s30_s16 }
   0x5   :  { %p1884_p0 = scmp.ne.s32.totalorder %s30_s16, %s1883_s17  ;;  %p1889_p2 = scmp.lt.s32.totalorder %s1883_s17, %s1883_s17 }
   0x7   :  { %p1890_p3 = por %p1889_p2, %p1888_p1 }
   0x9   :  { %p1891_p4 = pnand %p1890_p3, %p1884_p0 }
   0xb   :  { %1894 = shalt.err (!%p1891_p4)
}
   0xc   :  { %s1962_s18 = smov 128   ;;  %s1963_s19 = smov 8  }
   0xd   :  { %35 = dma.hbm_to_vmem [thread:$0]  %s2248_s1, 2048, %s30_s16, [#allocation7], %s1962_s18, %s1962_s18, %s1963_s19  }
   0xe   :  { %s1964_s22 = smov [#allocation3]  }
   0xf   :  { %s17_s23 = sshll.u32 %s1964_s22, 4  ;;  %s18_s23 = int_to_ptr.vmem [resolvable:$true] %s17_s23 }
  0x10   :  { %s1903_s24 = scalar_lea.vmem %s18_s23, 1024  ;;  %p1908_p6 = scmp.lt.s32.totalorder %s18_s23, %s18_s23 }
  0x11   :  { %p1904_p5 = scmp.ne.s32.totalorder %s18_s23, %s1903_s24  ;;  %p1909_p7 = scmp.lt.s32.totalorder %s1903_s24, %s1903_s24 }
  0x13   :  { %p1910_p8 = por %p1909_p7, %p1908_p6 }
  0x15   :  { %p1911_p9 = pnand %p1910_p8, %p1904_p5 }
  0x17   :  { %1914 = shalt.err (!%p1911_p9)
}
  0x18   :  { %s1965_s25 = smov 64   ;;  %s1966_s26 = smov 4  }
  0x19   :  { %23 = dma.hbm_to_vmem [thread:$0]  %s2247_s0, 1024, %s18_s23, [#allocation4], %s1965_s25, %s1965_s25, %s1966_s26  }
  0x1a   :  { %s1967_s29 = smov [#allocation8]  }
  0x1b   :  { %s41_s30 = sshll.u32 %s1967_s29, 4  ;;  %s42_s30 = int_to_ptr.vmem [resolvable:$true] %s41_s30 }
  0x1c   :  { %s1923_s1 = scalar_lea.vmem %s42_s30, 6144  ;;  %p1928_p11 = scmp.lt.s32.totalorder %s42_s30, %s42_s30 }
  0x1d   :  { %p1924_p10 = scmp.ne.s32.totalorder %s42_s30, %s1923_s1  ;;  %p1929_p12 = scmp.lt.s32.totalorder %s1923_s1, %s1923_s1 }
  0x1f   :  { %p1930_p13 = por %p1929_p12, %p1928_p11 }
  0x21   :  { %p1931_p0 = pnand %p1930_p13, %p1924_p10 }
  0x23   :  { %1934 = shalt.err (!%p1931_p0)
}
  0x24   :  { %47 = dma.hbm_to_vmem [thread:$0]  %s2249_s2, 6144, %s42_s30, [#allocation7], %s1962_s18, %s1962_s18, %s1963_s19  }
  0x25   :  { %1955 = dma.done.wait [#allocation4], 1024  }
  0x26   :  { %1956 = vsyncadd [#allocation4], 4294966272 }
  0x27   :  { %1957 = dma.done.wait [#allocation7], 8192  }
  0x28   :  { %1958 = vsyncadd [#allocation7], 4294959104  ;;  %v1968_v0 = vmov 0   ;;  %v1779_v1 = vld [vmem:[#allocation8 + $0x74] ss:$8 sps:$4 sm:$0xff]   ;;  %v60_v17 = vld [vmem:[#allocation6] sm:$0xff] }
  0x29   :  { %244 = vmatprep.mubr.bf16.mxu0 %v1968_v0  ;;  %v1781_v2 = vld [vmem:[#allocation8 + $0x70] ss:$8 sps:$4 sm:$0xff]   ;;  %212 = vmatprep.subr.bf16.mxu0 %v1779_v1  ;;  %v1782_v3 = vld [vmem:[#allocation8 + $0x64] ss:$8 sps:$4 sm:$0xff]   ;;  %v1784_v4 = vld [vmem:[#allocation8 + $0x60] ss:$8 sps:$4 sm:$0xff]  }
  0x2a   :  { %213 = vmatpush1.bf16.msra.mxu0 %v1781_v2  ;;  %v1785_v5 = vld [vmem:[#allocation8 + $0x54] ss:$8 sps:$4 sm:$0xff]   ;;  %v1787_v6 = vld [vmem:[#allocation8 + $0x50] ss:$8 sps:$4 sm:$0xff]   ;;  %v1788_v7 = vld [vmem:[#allocation8 + $0x44] ss:$8 sps:$4 sm:$0xff]  }
  0x2b   :  { %214 = vmatprep.subr.bf16.mxu0 %v1782_v3  ;;  %v1790_v8 = vld [vmem:[#allocation8 + $0x40] ss:$8 sps:$4 sm:$0xff]   ;;  %v1791_v9 = vld [vmem:[#allocation8 + $0x34] ss:$8 sps:$4 sm:$0xff]   ;;  %v1793_v10 = vld [vmem:[#allocation8 + $0x30] ss:$8 sps:$4 sm:$0xff]  }
  0x2c   :  { %v1794_v11 = vld [vmem:[#allocation8 + $0x24] ss:$8 sps:$4 sm:$0xff]   ;;  %v1796_v12 = vld [vmem:[#allocation8 + $0x20] ss:$8 sps:$4 sm:$0xff]   ;;  %v1797_v13 = vld [vmem:[#allocation8 + $0x14] ss:$8 sps:$4 sm:$0xff]  }
  0x2d   :  { %v1799_v14 = vld [vmem:[#allocation8 + $0x10] ss:$8 sps:$4 sm:$0xff]   ;;  %v1800_v15 = vld [vmem:[#allocation8 + $0x4] ss:$8 sps:$4 sm:$0xff]   ;;  %v1802_v16 = vld [vmem:[#allocation8] ss:$8 sps:$4 sm:$0xff]  }
  0x2e   :  { %215 = vmatpush1.bf16.msra.mxu0 %v1784_v4  ;;  %v61_v18 = vld [vmem:[#allocation6 + $0x8] sm:$0xff]  ;;  %v62_v20 = vld [vmem:[#allocation6 + $0x10] sm:$0xff]  ;;  %v63_v21 = vld [vmem:[#allocation6 + $0x18] sm:$0xff] }
  0x2f   :  { %216 = vmatprep.subr.bf16.mxu0 %v1785_v5  ;;  %v108_v19 = vpack.c.bf16 %v61_v18, %v60_v17  ;;  %v109_v22 = vpack.c.bf16 %v63_v21, %v62_v20  ;;  %v64_v23 = vld [vmem:[#allocation6 + $0x20] sm:$0xff]  ;;  %v65_v24 = vld [vmem:[#allocation6 + $0x28] sm:$0xff]  ;;  %v66_v26 = vld [vmem:[#allocation6 + $0x30] sm:$0xff] }
  0x30   :  { %v110_v25 = vpack.c.bf16 %v65_v24, %v64_v23  ;;  %v67_v27 = vld [vmem:[#allocation6 + $0x38] sm:$0xff]  ;;  %v68_v29 = vld [vmem:[#allocation6 + $0x40] sm:$0xff]  ;;  %v69_v30 = vld [vmem:[#allocation6 + $0x48] sm:$0xff] }
  0x31   :  { %v111_v28 = vpack.c.bf16 %v67_v27, %v66_v26  ;;  %v112_v31 = vpack.c.bf16 %v69_v30, %v68_v29  ;;  %v70_v32 = vld [vmem:[#allocation6 + $0x50] sm:$0xff]  ;;  %v71_v33 = vld [vmem:[#allocation6 + $0x58] sm:$0xff]  ;;  %v72_v35 = vld [vmem:[#allocation6 + $0x60] sm:$0xff] }
  0x32   :  { %217 = vmatpush1.bf16.msra.mxu0 %v1787_v6  ;;  %v113_v34 = vpack.c.bf16 %v71_v33, %v70_v32  ;;  %v73_v36 = vld [vmem:[#allocation6 + $0x68] sm:$0xff]  ;;  %v74_v38 = vld [vmem:[#allocation6 + $0x70] sm:$0xff]  ;;  %v75_v39 = vld [vmem:[#allocation6 + $0x78] sm:$0xff] }
  0x33   :  { %218 = vmatprep.subr.bf16.mxu0 %v1788_v7  ;;  %v114_v37 = vpack.c.bf16 %v73_v36, %v72_v35  ;;  %v115_v40 = vpack.c.bf16 %v75_v39, %v74_v38  ;;  %v1803_v41 = vld [vmem:[#allocation3] sm:$0xff]   ;;  %v1804_v20 = vld [vmem:[#allocation3 + $0x8] sm:$0xff]   ;;  %v1805_v21 = vld [vmem:[#allocation3 + $0x10] sm:$0xff]  }
  0x34   :  { %1690 = vmatprep.mubr.bf16.mxu1 %v1803_v41  ;;  %v1816_v23 = vld [vmem:[#allocation8 + $0xe4] ss:$8 sps:$4 sm:$0xff]   ;;  %v1814_v24 = vld [vmem:[#allocation8 + $0xe0] ss:$8 sps:$4 sm:$0xff]   ;;  %v1806_v26 = vld [vmem:[#allocation3 + $0x18] sm:$0xff]  }
  0x35   :  { %v1807_v27 = vld [vmem:[#allocation3 + $0x20] sm:$0xff]   ;;  %v1808_v32 = vld [vmem:[#allocation3 + $0x28] sm:$0xff]   ;;  %v1809_v33 = vld [vmem:[#allocation3 + $0x30] sm:$0xff]  }
  0x36   :  { %219 = vmatpush1.bf16.msra.mxu0 %v1790_v8  ;;  %v1822_v29 = vld [vmem:[#allocation8 + $0xc4] ss:$8 sps:$4 sm:$0xff]   ;;  %v1820_v30 = vld [vmem:[#allocation8 + $0xc0] ss:$8 sps:$4 sm:$0xff]   ;;  %v1810_v35 = vld [vmem:[#allocation3 + $0x38] sm:$0xff]  }
  0x37   :  { %220 = vmatprep.subr.bf16.mxu0 %v1791_v9  ;;  %v1828_v36 = vld [vmem:[#allocation8 + $0xa4] ss:$8 sps:$4 sm:$0xff]   ;;  %v1831_v38 = vld [vmem:[#allocation8 + $0x94] ss:$8 sps:$4 sm:$0xff]   ;;  %v1829_v39 = vld [vmem:[#allocation8 + $0x90] ss:$8 sps:$4 sm:$0xff]  }
  0x38   :  { %v1832_v41 = vld [vmem:[#allocation8 + $0x80] ss:$8 sps:$4 sm:$0xff]  }
  0x3a   :  { %221 = vmatpush1.bf16.msra.mxu0 %v1793_v10 }
  0x3b   :  { %222 = vmatprep.subr.bf16.mxu0 %v1794_v11 }
  0x3e   :  { %223 = vmatpush1.bf16.msra.mxu0 %v1796_v12 }
  0x3f   :  { %224 = vmatprep.subr.bf16.mxu0 %v1797_v13 }
  0x42   :  { %225 = vmatpush1.bf16.msra.mxu0 %v1799_v14 }
  0x43   :  { %226 = vmatprep.subr.bf16.mxu0 %v1800_v15 }
  0x46   :  { %227 = vmatpush1.bf16.msra.mxu0 %v1802_v16 }
  0x49   :  { %245 = vmatmul.mubr.bf16.vlgmr.msra.gmra.mxu0 %v108_v19  ;;  %v1813_v19 = vld [vmem:[#allocation8 + $0xf4] ss:$8 sps:$4 sm:$0xff]  }
  0x4a   :  { %254 = vmatprep.mubr.bf16.mxu0 %v1968_v0 }
  0x51   :  { %255 = vmatmul.mubr.bf16.gmra.mxu0 %v109_v22  ;;  %v1811_v22 = vld [vmem:[#allocation8 + $0xf0] ss:$8 sps:$4 sm:$0xff]  }
  0x52   :  { %264 = vmatprep.mubr.bf16.mxu0 %v1968_v0 }
  0x59   :  { %265 = vmatmul.mubr.bf16.gmra.mxu0 %v110_v25  ;;  %v1819_v25 = vld [vmem:[#allocation8 + $0xd4] ss:$8 sps:$4 sm:$0xff]  }
  0x5a   :  { %274 = vmatprep.mubr.bf16.mxu0 %v1968_v0 }
  0x61   :  { %275 = vmatmul.mubr.bf16.gmra.mxu0 %v111_v28  ;;  %v1817_v28 = vld [vmem:[#allocation8 + $0xd0] ss:$8 sps:$4 sm:$0xff]  }
  0x62   :  { %284 = vmatprep.mubr.bf16.mxu0 %v1968_v0 }
  0x69   :  { %285 = vmatmul.mubr.bf16.gmra.mxu0 %v112_v31  ;;  %v1825_v31 = vld [vmem:[#allocation8 + $0xb4] ss:$8 sps:$4 sm:$0xff]  }
  0x6a   :  { %294 = vmatprep.mubr.bf16.mxu0 %v1968_v0 }
  0x71   :  { %295 = vmatmul.mubr.bf16.gmra.mxu0 %v113_v34  ;;  %v1823_v34 = vld [vmem:[#allocation8 + $0xb0] ss:$8 sps:$4 sm:$0xff]  }
  0x72   :  { %304 = vmatprep.mubr.bf16.mxu0 %v1968_v0 }
  0x79   :  { %305 = vmatmul.mubr.bf16.gmra.mxu0 %v114_v37  ;;  %v1826_v37 = vld [vmem:[#allocation8 + $0xa0] ss:$8 sps:$4 sm:$0xff]  }
  0x7a   :  { %314 = vmatprep.mubr.bf16.mxu0 %v1968_v0 }
  0x81   :  { %315 = vmatmul.mubr.bf16.gmra.mxu0 %v115_v40  ;;  %v1834_v40 = vld [vmem:[#allocation8 + $0x84] ss:$8 sps:$4 sm:$0xff]  }
 0x109   :  { %v2018_v42 = vpop.f32.mrf.mxu0 }
 0x10b   :  { %v248_v43 = vpop.f32.mrf.mxu0 }
 0x10d   :  { %v2020_v44 = vpop.f32.mrf.mxu0 }
 0x10f   :  { %v252_v45 = vpop.f32.mrf.mxu0 }
 0x110   :  { %v325_v46 = vpack.c.bf16 %v252_v45, %v248_v43 }
 0x111   :  { %v2022_v47 = vpop.f32.mrf.mxu0 }
 0x113   :  { %v258_v48 = vpop.f32.mrf.mxu0 }
 0x115   :  { %v2024_v49 = vpop.f32.mrf.mxu0 }
 0x117   :  { %v262_v50 = vpop.f32.mrf.mxu0 }
 0x118   :  { %v326_v51 = vpack.c.bf16 %v262_v50, %v258_v48  ;;  %v2055_v50 = vld [vmem:[%s2250_s3] ss:$0 sm:$0xff] }
 0x119   :  { %v2026_v52 = vpop.f32.mrf.mxu0 }
 0x11b   :  { %v268_v53 = vpop.f32.mrf.mxu0 }
 0x11d   :  { %v2028_v54 = vpop.f32.mrf.mxu0 }
 0x11f   :  { %v272_v55 = vpop.f32.mrf.mxu0 }
 0x120   :  { %v327_v18 = vpack.c.bf16 %v272_v55, %v268_v53 }
 0x121   :  { %v2030_v56 = vpop.f32.mrf.mxu0 }
 0x123   :  { %v278_v57 = vpop.f32.mrf.mxu0 }
 0x125   :  { %v2032_v58 = vpop.f32.mrf.mxu0 }
 0x127   :  { %v282_v59 = vpop.f32.mrf.mxu0 }
 0x128   :  { %v328_v17 = vpack.c.bf16 %v282_v59, %v278_v57 }
 0x129   :  { %v2034_v60 = vpop.f32.mrf.mxu0 }
 0x12b   :  { %v288_v61 = vpop.f32.mrf.mxu0 }
 0x12d   :  { %v2036_v62 = vpop.f32.mrf.mxu0 }
 0x12f   :  { %v292_v63 = vpop.f32.mrf.mxu0 }
 0x130   :  { %v329_v16 = vpack.c.bf16 %v292_v63, %v288_v61 }
 0x131   :  { %v2038_v1 = vpop.f32.mrf.mxu0 }
 0x133   :  { %v298_v2 = vpop.f32.mrf.mxu0 }
 0x135   :  { %v2040_v3 = vpop.f32.mrf.mxu0 }
 0x137   :  { %v302_v4 = vpop.f32.mrf.mxu0 }
 0x138   :  { %v330_v15 = vpack.c.bf16 %v302_v4, %v298_v2 }
 0x139   :  { %v2042_v5 = vpop.f32.mrf.mxu0 }
 0x13b   :  { %v308_v6 = vpop.f32.mrf.mxu0 }
 0x13d   :  { %v2044_v7 = vpop.f32.mrf.mxu0 }
 0x13f   :  { %v312_v8 = vpop.f32.mrf.mxu0 }
 0x140   :  { %v331_v14 = vpack.c.bf16 %v312_v8, %v308_v6 }
 0x141   :  { %v2046_v9 = vpop.f32.mrf.mxu0 }
 0x143   :  { %v318_v10 = vpop.f32.mrf.mxu0 }
 0x145   :  { %v2048_v11 = vpop.f32.mrf.mxu0 }
 0x147   :  { %v322_v12 = vpop.f32.mrf.mxu0 }
 0x148   :  { %v332_v13 = vpack.c.bf16 %v322_v12, %v318_v10 }
 0x14a   :  { %1674 = vmatprep.subr.bf16.mxu1 %v332_v13 }
 0x14b   :  { %1675 = vmatpush3.bf16.msra.mxu1 %v332_v13 }
 0x14c   :  { %1676 = vmatprep.subr.bf16.mxu1 %v331_v14 }
 0x14f   :  { %1677 = vmatpush3.bf16.msra.mxu1 %v331_v14 }
 0x150   :  { %1678 = vmatprep.subr.bf16.mxu1 %v330_v15 }
 0x153   :  { %1679 = vmatpush3.bf16.msra.mxu1 %v330_v15 }
 0x154   :  { %1680 = vmatprep.subr.bf16.mxu1 %v329_v16 }
 0x157   :  { %1681 = vmatpush3.bf16.msra.mxu1 %v329_v16 }
 0x158   :  { %1682 = vmatprep.subr.bf16.mxu1 %v328_v17 }
 0x15b   :  { %1683 = vmatpush3.bf16.msra.mxu1 %v328_v17 }
 0x15c   :  { %1684 = vmatprep.subr.bf16.mxu1 %v327_v18 }
 0x15f   :  { %1685 = vmatpush3.bf16.msra.mxu1 %v327_v18 }
 0x160   :  { %1686 = vmatprep.subr.bf16.mxu1 %v326_v51 }
 0x163   :  { %1687 = vmatpush3.bf16.msra.mxu1 %v326_v51 }
 0x164   :  { %1688 = vmatprep.subr.bf16.mxu1 %v325_v46 }
 0x167   :  { %1689 = vmatpush3.bf16.msra.mxu1 %v325_v46 }
 0x168   :  { %686 = vmatprep.subr.bf16.mxu1 %v1813_v19 }
 0x16a   :  { %1691 = vmatmul.mubr.bf16.vlgmr.msra.gmra.mxu1 %v1804_v20 }
 0x16b   :  { %1694 = vmatprep.mubr.bf16.mxu1 %v1805_v21  ;;  %687 = vmatpush1.bf16.msra.mxu1 %v1811_v22 }
 0x16c   :  { %688 = vmatprep.subr.bf16.mxu1 %v1816_v23 }
 0x16f   :  { %689 = vmatpush1.bf16.msra.mxu1 %v1814_v24 }
 0x170   :  { %690 = vmatprep.subr.bf16.mxu1 %v1819_v25 }
 0x172   :  { %1695 = vmatmul.mubr.bf16.gmra.mxu1 %v1806_v26 }
 0x173   :  { %1698 = vmatprep.mubr.bf16.mxu1 %v1807_v27  ;;  %691 = vmatpush1.bf16.msra.mxu1 %v1817_v28 }
 0x174   :  { %692 = vmatprep.subr.bf16.mxu1 %v1822_v29 }
 0x177   :  { %693 = vmatpush1.bf16.msra.mxu1 %v1820_v30 }
 0x178   :  { %694 = vmatprep.subr.bf16.mxu1 %v1825_v31 }
 0x17a   :  { %1699 = vmatmul.mubr.bf16.gmra.mxu1 %v1808_v32 }
 0x17b   :  { %1702 = vmatprep.mubr.bf16.mxu1 %v1809_v33  ;;  %695 = vmatpush1.bf16.msra.mxu1 %v1823_v34 }
 0x17c   :  { %696 = vmatprep.subr.bf16.mxu1 %v1828_v36 }
 0x17f   :  { %697 = vmatpush1.bf16.msra.mxu1 %v1826_v37 }
 0x180   :  { %698 = vmatprep.subr.bf16.mxu1 %v1831_v38 }
 0x182   :  { %1703 = vmatmul.mubr.bf16.gmra.mxu1 %v1810_v35 }
 0x183   :  { %718 = vmatprep.mubr.bf16.mxu1 %v1968_v0  ;;  %699 = vmatpush1.bf16.msra.mxu1 %v1829_v39 }
 0x184   :  { %700 = vmatprep.subr.bf16.mxu1 %v1834_v40 }
 0x187   :  { %701 = vmatpush1.bf16.msra.mxu1 %v1832_v41 }
 0x22a   :  { %v1692_v43 = vpop.f32.mrf.mxu1 }
 0x22b   :  { %v496_v2 = vadd.f32 %v1692_v43, %v2022_v47 }
 0x22c   :  { %v431_v45 = vpop.f32.mrf.mxu1 }
 0x22d   :  { %v494_v46 = vadd.f32 %v431_v45, %v2018_v42  ;;  %v519_v13 = vadd.f32 %v2055_v50, %v496_v2 }
 0x22e   :  { %v1693_v48 = vpop.f32.mrf.mxu1 }
 0x22f   :  { %v517_v53 = vadd.f32 %v2055_v50, %v494_v46  ;;  %v497_v59 = vadd.f32 %v1693_v48, %v2024_v49  ;;  %v535_v15 = vmax.f32 %v519_v13, 0.0 }
 0x230   :  { %v434_v51 = vpop.f32.mrf.mxu1 }
 0x231   :  { %v495_v55 = vadd.f32 %v434_v51, %v2020_v44  ;;  %v533_v42 = vmax.f32 %v517_v53, 0.0  ;;  %v520_v8 = vadd.f32 %v2055_v50, %v497_v59 }
 0x232   :  { %v1696_v57 = vpop.f32.mrf.mxu1 }
 0x233   :  { %v518_v61 = vadd.f32 %v2055_v50, %v495_v55  ;;  %v536_v44 = vmax.f32 %v520_v8, 0.0  ;;  %v500_v23 = vadd.f32 %v1696_v57, %v2030_v56 }
 0x234   :  { %v447_v63 = vpop.f32.mrf.mxu1 }
 0x235   :  { %v534_v4 = vmax.f32 %v518_v61, 0.0  ;;  %v498_v16 = vadd.f32 %v447_v63, %v2026_v52  ;;  %v582_v17 = vpack.c.bf16 %v536_v44, %v535_v15  ;;  %v523_v26 = vadd.f32 %v2055_v50, %v500_v23 }
 0x236   :  { %v1697_v6 = vpop.f32.mrf.mxu1 }
 0x237   :  { %v581_v10 = vpack.c.bf16 %v534_v4, %v533_v42  ;;  %v521_v19 = vadd.f32 %v2055_v50, %v498_v16  ;;  %v501_v20 = vadd.f32 %v1697_v6, %v2032_v58  ;;  %v539_v30 = vmax.f32 %v523_v26, 0.0  ;;  %v1835_v42 = vld [vmem:[#allocation3] sm:$0xff]  }
 0x238   :  { %v450_v12 = vpop.f32.mrf.mxu1  ;;  %1722 = vmatprep.mubr.bf16.mxu0 %v1835_v42  ;;  %v1864_v42 = vld [vmem:[#allocation8 + $0x100] ss:$8 sps:$4 sm:$0xff]  }
 0x239   :  { %719 = vmatmul.mubr.bf16.vlgmr.msra.gmra.mxu1 %v581_v10  ;;  %v499_v49 = vadd.f32 %v450_v12, %v2028_v54  ;;  %v537_v54 = vmax.f32 %v521_v19, 0.0  ;;  %v524_v24 = vadd.f32 %v2055_v50, %v501_v20 }
 0x23a   :  { %728 = vmatprep.mubr.bf16.mxu1 %v1968_v0  ;;  %v1700_v14 = vpop.f32.mrf.mxu1 }
 0x23b   :  { %v522_v47 = vadd.f32 %v2055_v50, %v499_v49  ;;  %v540_v27 = vmax.f32 %v524_v24, 0.0  ;;  %v504_v37 = vadd.f32 %v1700_v14, %v2038_v1 }
 0x23c   :  { %v463_v18 = vpop.f32.mrf.mxu1 }
 0x23d   :  { %v538_v21 = vmax.f32 %v522_v47, 0.0  ;;  %v502_v58 = vadd.f32 %v463_v18, %v2034_v60  ;;  %v584_v56 = vpack.c.bf16 %v540_v27, %v539_v30  ;;  %v527_v40 = vadd.f32 %v2055_v50, %v504_v37 }
 0x23e   :  { %v1701_v22 = vpop.f32.mrf.mxu1 }
 0x23f   :  { %v583_v25 = vpack.c.bf16 %v538_v21, %v537_v54  ;;  %v525_v33 = vadd.f32 %v2055_v50, %v502_v58  ;;  %v505_v34 = vadd.f32 %v1701_v22, %v2040_v3  ;;  %v543_v45 = vmax.f32 %v527_v40, 0.0  ;;  %v1848_v40 = vld [vmem:[#allocation8 + $0x164] ss:$8 sps:$4 sm:$0xff]  }
 0x240   :  { %v466_v52 = vpop.f32.mrf.mxu1 }
 0x241   :  { %729 = vmatmul.mubr.bf16.gmra.mxu1 %v582_v17  ;;  %v503_v28 = vadd.f32 %v466_v52, %v2036_v62  ;;  %v541_v62 = vmax.f32 %v525_v33, 0.0  ;;  %v528_v38 = vadd.f32 %v2055_v50, %v505_v34 }
 0x242   :  { %738 = vmatprep.mubr.bf16.mxu1 %v1968_v0  ;;  %v1704_v29 = vpop.f32.mrf.mxu1 }
 0x243   :  { %v526_v31 = vadd.f32 %v2055_v50, %v503_v28  ;;  %v544_v41 = vmax.f32 %v528_v38, 0.0  ;;  %v508_v55 = vadd.f32 %v1704_v29, %v2046_v9  ;;  %v1836_v38 = vld [vmem:[#allocation3 + $0x8] sm:$0xff]  }
 0x244   :  { %v479_v32 = vpop.f32.mrf.mxu1 }
 0x245   :  { %v542_v35 = vmax.f32 %v526_v31, 0.0  ;;  %v506_v3 = vadd.f32 %v479_v32, %v2042_v5  ;;  %v586_v48 = vpack.c.bf16 %v544_v41, %v543_v45  ;;  %v531_v61 = vadd.f32 %v2055_v50, %v508_v55  ;;  %v1846_v41 = vld [vmem:[#allocation8 + $0x160] ss:$8 sps:$4 sm:$0xff]   ;;  %v1838_v45 = vld [vmem:[#allocation3 + $0x18] sm:$0xff]   ;;  %v1841_v55 = vld [vmem:[#allocation3 + $0x30] sm:$0xff]  }
 0x246   :  { %v1705_v36 = vpop.f32.mrf.mxu1 }
 0x247   :  { %v585_v39 = vpack.c.bf16 %v542_v35, %v541_v62  ;;  %v529_v1 = vadd.f32 %v2055_v50, %v506_v3  ;;  %v509_v51 = vadd.f32 %v1705_v36, %v2048_v11  ;;  %v547_v63 = vmax.f32 %v531_v61, 0.0  ;;  %v1845_v62 = vld [vmem:[#allocation8 + $0x174] ss:$8 sps:$4 sm:$0xff]   ;;  %v1839_v3 = vld [vmem:[#allocation3 + $0x20] sm:$0xff]  }
 0x248   :  { %v482_v60 = vpop.f32.mrf.mxu1  ;;  %v1858_v61 = vld [vmem:[#allocation8 + $0x120] ss:$8 sps:$4 sm:$0xff]  }
 0x249   :  { %739 = vmatmul.mubr.bf16.gmra.mxu1 %v583_v25  ;;  %v507_v43 = vadd.f32 %v482_v60, %v2044_v7  ;;  %v545_v57 = vmax.f32 %v529_v1, 0.0  ;;  %v532_v59 = vadd.f32 %v2055_v50, %v509_v51  ;;  %v1843_v60 = vld [vmem:[#allocation8 + $0x170] ss:$8 sps:$4 sm:$0xff]   ;;  %v1852_v1 = vld [vmem:[#allocation8 + $0x140] ss:$8 sps:$4 sm:$0xff]  }
 0x24a   :  { %748 = vmatprep.mubr.bf16.mxu1 %v1968_v0  ;;  %v1857_v51 = vld [vmem:[#allocation8 + $0x134] ss:$8 sps:$4 sm:$0xff]  }
 0x24b   :  { %v530_v46 = vadd.f32 %v2055_v50, %v507_v43  ;;  %v548_v5 = vmax.f32 %v532_v59, 0.0  ;;  %v1851_v43 = vld [vmem:[#allocation8 + $0x154] ss:$8 sps:$4 sm:$0xff]  }
 0x24c   :  { %v1842_v59 = vld [vmem:[#allocation3 + $0x38] sm:$0xff]  }
 0x24d   :  { %v546_v53 = vmax.f32 %v530_v46, 0.0  ;;  %v588_v2 = vpack.c.bf16 %v548_v5, %v547_v63  ;;  %v1849_v46 = vld [vmem:[#allocation8 + $0x150] ss:$8 sps:$4 sm:$0xff]   ;;  %v1863_v5 = vld [vmem:[#allocation8 + $0x114] ss:$8 sps:$4 sm:$0xff]  }
 0x24e   :  { %v1861_v63 = vld [vmem:[#allocation8 + $0x110] ss:$8 sps:$4 sm:$0xff]  }
 0x24f   :  { %v587_v7 = vpack.c.bf16 %v546_v53, %v545_v57  ;;  %v1840_v53 = vld [vmem:[#allocation3 + $0x28] sm:$0xff]   ;;  %v1855_v57 = vld [vmem:[#allocation8 + $0x130] ss:$8 sps:$4 sm:$0xff]  }
 0x251   :  { %749 = vmatmul.mubr.bf16.gmra.mxu1 %v584_v56 }
 0x252   :  { %758 = vmatprep.mubr.bf16.mxu1 %v1968_v0 }
 0x259   :  { %759 = vmatmul.mubr.bf16.gmra.mxu1 %v585_v39  ;;  %v1837_v39 = vld [vmem:[#allocation3 + $0x10] sm:$0xff]  }
 0x25a   :  { %768 = vmatprep.mubr.bf16.mxu1 %v1968_v0 }
 0x261   :  { %769 = vmatmul.mubr.bf16.gmra.mxu1 %v586_v48  ;;  %v1854_v48 = vld [vmem:[#allocation8 + $0x144] ss:$8 sps:$4 sm:$0xff]  }
 0x262   :  { %778 = vmatprep.mubr.bf16.mxu1 %v1968_v0 }
 0x269   :  { %779 = vmatmul.mubr.bf16.gmra.mxu1 %v587_v7  ;;  %v1860_v7 = vld [vmem:[#allocation8 + $0x124] ss:$8 sps:$4 sm:$0xff]  }
 0x26a   :  { %788 = vmatprep.mubr.bf16.mxu1 %v1968_v0 }
 0x271   :  { %789 = vmatmul.mubr.bf16.gmra.mxu1 %v588_v2  ;;  %v1866_v2 = vld [vmem:[#allocation8 + $0x104] ss:$8 sps:$4 sm:$0xff]  }
 0x2f9   :  { %v2095_v4 = vpop.f32.mrf.mxu1 }
 0x2fb   :  { %v722_v11 = vpop.f32.mrf.mxu1 }
 0x2fd   :  { %v2097_v6 = vpop.f32.mrf.mxu1 }
 0x2ff   :  { %v726_v9 = vpop.f32.mrf.mxu1 }
 0x300   :  { %v799_v8 = vpack.c.bf16 %v726_v9, %v722_v11 }
 0x301   :  { %v2099_v10 = vpop.f32.mrf.mxu1 }
 0x303   :  { %v732_v12 = vpop.f32.mrf.mxu1 }
 0x305   :  { %v2101_v50 = vpop.f32.mrf.mxu1 }
 0x307   :  { %v736_v13 = vpop.f32.mrf.mxu1 }
 0x308   :  { %v800_v44 = vpack.c.bf16 %v736_v13, %v732_v12  ;;  %v2132_v13 = vld [vmem:[%s2250_s3 + $0x1] ss:$0 sm:$0xff] }
 0x309   :  { %v2103_v49 = vpop.f32.mrf.mxu1 }
 0x30b   :  { %v742_v14 = vpop.f32.mrf.mxu1 }
 0x30d   :  { %v2105_v15 = vpop.f32.mrf.mxu1 }
 0x30f   :  { %v746_v16 = vpop.f32.mrf.mxu1 }
 0x310   :  { %v801_v37 = vpack.c.bf16 %v746_v16, %v742_v14 }
 0x311   :  { %v2107_v47 = vpop.f32.mrf.mxu1 }
 0x313   :  { %v752_v17 = vpop.f32.mrf.mxu1 }
 0x315   :  { %v2109_v18 = vpop.f32.mrf.mxu1 }
 0x317   :  { %v756_v19 = vpop.f32.mrf.mxu1 }
 0x318   :  { %v802_v36 = vpack.c.bf16 %v756_v19, %v752_v17 }
 0x319   :  { %v2111_v20 = vpop.f32.mrf.mxu1 }
 0x31b   :  { %v762_v21 = vpop.f32.mrf.mxu1 }
 0x31d   :  { %v2113_v22 = vpop.f32.mrf.mxu1 }
 0x31f   :  { %v766_v23 = vpop.f32.mrf.mxu1 }
 0x320   :  { %v803_v35 = vpack.c.bf16 %v766_v23, %v762_v21 }
 0x321   :  { %v2115_v54 = vpop.f32.mrf.mxu1 }
 0x323   :  { %v772_v24 = vpop.f32.mrf.mxu1 }
 0x325   :  { %v2117_v25 = vpop.f32.mrf.mxu1 }
 0x327   :  { %v776_v52 = vpop.f32.mrf.mxu1 }
 0x328   :  { %v804_v34 = vpack.c.bf16 %v776_v52, %v772_v24 }
 0x329   :  { %v2119_v26 = vpop.f32.mrf.mxu1 }
 0x32b   :  { %v782_v27 = vpop.f32.mrf.mxu1 }
 0x32d   :  { %v2121_v28 = vpop.f32.mrf.mxu1 }
 0x32f   :  { %v786_v29 = vpop.f32.mrf.mxu1 }
 0x330   :  { %v805_v33 = vpack.c.bf16 %v786_v29, %v782_v27 }
 0x331   :  { %v2123_v30 = vpop.f32.mrf.mxu1 }
 0x333   :  { %v792_v58 = vpop.f32.mrf.mxu1 }
 0x335   :  { %v2125_v31 = vpop.f32.mrf.mxu1 }
 0x337   :  { %v796_v56 = vpop.f32.mrf.mxu1 }
 0x338   :  { %v806_v32 = vpack.c.bf16 %v796_v56, %v792_v58 }
 0x33a   :  { %1706 = vmatprep.subr.bf16.mxu0 %v806_v32 }
 0x33b   :  { %1707 = vmatpush3.bf16.msra.mxu0 %v806_v32 }
 0x33c   :  { %1708 = vmatprep.subr.bf16.mxu0 %v805_v33 }
 0x33f   :  { %1709 = vmatpush3.bf16.msra.mxu0 %v805_v33 }
 0x340   :  { %1710 = vmatprep.subr.bf16.mxu0 %v804_v34 }
 0x343   :  { %1711 = vmatpush3.bf16.msra.mxu0 %v804_v34 }
 0x344   :  { %1712 = vmatprep.subr.bf16.mxu0 %v803_v35 }
 0x347   :  { %1713 = vmatpush3.bf16.msra.mxu0 %v803_v35 }
 0x348   :  { %1714 = vmatprep.subr.bf16.mxu0 %v802_v36 }
 0x34b   :  { %1715 = vmatpush3.bf16.msra.mxu0 %v802_v36 }
 0x34c   :  { %1716 = vmatprep.subr.bf16.mxu0 %v801_v37 }
 0x34f   :  { %1717 = vmatpush3.bf16.msra.mxu0 %v801_v37 }
 0x350   :  { %1718 = vmatprep.subr.bf16.mxu0 %v800_v44 }
 0x353   :  { %1719 = vmatpush3.bf16.msra.mxu0 %v800_v44 }
 0x354   :  { %1720 = vmatprep.subr.bf16.mxu0 %v799_v8 }
 0x357   :  { %1721 = vmatpush3.bf16.msra.mxu0 %v799_v8 }
 0x358   :  { %1161 = vmatprep.subr.bf16.mxu0 %v1845_v62 }
 0x35a   :  { %1723 = vmatmul.mubr.bf16.vlgmr.msra.gmra.mxu0 %v1836_v38 }
 0x35b   :  { %1726 = vmatprep.mubr.bf16.mxu0 %v1837_v39  ;;  %1162 = vmatpush1.bf16.msra.mxu0 %v1843_v60 }
 0x35c   :  { %1163 = vmatprep.subr.bf16.mxu0 %v1848_v40 }
 0x35f   :  { %1164 = vmatpush1.bf16.msra.mxu0 %v1846_v41 }
 0x360   :  { %1165 = vmatprep.subr.bf16.mxu0 %v1851_v43 }
 0x362   :  { %1727 = vmatmul.mubr.bf16.gmra.mxu0 %v1838_v45 }
 0x363   :  { %1730 = vmatprep.mubr.bf16.mxu0 %v1839_v3  ;;  %1166 = vmatpush1.bf16.msra.mxu0 %v1849_v46 }
 0x364   :  { %1167 = vmatprep.subr.bf16.mxu0 %v1854_v48 }
 0x367   :  { %1168 = vmatpush1.bf16.msra.mxu0 %v1852_v1 }
 0x368   :  { %1169 = vmatprep.subr.bf16.mxu0 %v1857_v51 }
 0x36a   :  { %1731 = vmatmul.mubr.bf16.gmra.mxu0 %v1840_v53 }
 0x36b   :  { %1734 = vmatprep.mubr.bf16.mxu0 %v1841_v55  ;;  %1170 = vmatpush1.bf16.msra.mxu0 %v1855_v57 }
 0x36c   :  { %1171 = vmatprep.subr.bf16.mxu0 %v1860_v7 }
 0x36f   :  { %1172 = vmatpush1.bf16.msra.mxu0 %v1858_v61 }
 0x370   :  { %1173 = vmatprep.subr.bf16.mxu0 %v1863_v5 }
 0x372   :  { %1735 = vmatmul.mubr.bf16.gmra.mxu0 %v1842_v59 }
 0x373   :  { %1193 = vmatprep.mubr.bf16.mxu0 %v1968_v0  ;;  %1174 = vmatpush1.bf16.msra.mxu0 %v1861_v63 }
 0x374   :  { %1175 = vmatprep.subr.bf16.mxu0 %v1866_v2 }
 0x377   :  { %1176 = vmatpush1.bf16.msra.mxu0 %v1864_v42 }
 0x41a   :  { %v1724_v11 = vpop.f32.mrf.mxu0 }
 0x41b   :  { %v970_v24 = vadd.f32 %v1724_v11, %v2099_v10 }
 0x41c   :  { %v905_v9 = vpop.f32.mrf.mxu0 }
 0x41d   :  { %v968_v8 = vadd.f32 %v905_v9, %v2095_v4  ;;  %v994_v32 = vadd.f32 %v2132_v13, %v970_v24 }
 0x41e   :  { %v1725_v12 = vpop.f32.mrf.mxu0 }
 0x41f   :  { %v992_v14 = vadd.f32 %v2132_v13, %v968_v8  ;;  %v971_v19 = vadd.f32 %v1725_v12, %v2101_v50  ;;  %v1010_v34 = vmax.f32 %v994_v32, 0.0 }
 0x420   :  { %v908_v44 = vpop.f32.mrf.mxu0 }
 0x421   :  { %v969_v16 = vadd.f32 %v908_v44, %v2097_v6  ;;  %v1008_v4 = vmax.f32 %v992_v14, 0.0  ;;  %v995_v29 = vadd.f32 %v2132_v13, %v971_v19 }
 0x422   :  { %v1728_v17 = vpop.f32.mrf.mxu0 }
 0x423   :  { %v993_v21 = vadd.f32 %v2132_v13, %v969_v16  ;;  %v1011_v6 = vmax.f32 %v995_v29, 0.0  ;;  %v974_v40 = vadd.f32 %v1728_v17, %v2107_v47 }
 0x424   :  { %v921_v23 = vpop.f32.mrf.mxu0 }
 0x425   :  { %v1009_v52 = vmax.f32 %v993_v21, 0.0  ;;  %v972_v35 = vadd.f32 %v921_v23, %v2103_v49  ;;  %v1057_v36 = vpack.c.bf16 %v1011_v6, %v1010_v34  ;;  %v998_v45 = vadd.f32 %v2132_v13, %v974_v40 }
 0x426   :  { %v1729_v27 = vpop.f32.mrf.mxu0 }
 0x427   :  { %v1056_v58 = vpack.c.bf16 %v1009_v52, %v1008_v4  ;;  %v996_v62 = vadd.f32 %v2132_v13, %v972_v35  ;;  %v975_v38 = vadd.f32 %v1729_v27, %v2109_v18  ;;  %v1014_v1 = vmax.f32 %v998_v45, 0.0  ;;  %v1867_v4 = vld [vmem:[#allocation3] sm:$0xff]  }
 0x428   :  { %v924_v56 = vpop.f32.mrf.mxu0  ;;  %1754 = vmatprep.mubr.bf16.mxu1 %v1867_v4 }
 0x429   :  { %1194 = vmatmul.mubr.bf16.vlgmr.msra.gmra.mxu0 %v1056_v58  ;;  %v973_v50 = vadd.f32 %v924_v56, %v2105_v15  ;;  %v1012_v15 = vmax.f32 %v996_v62, 0.0  ;;  %v999_v41 = vadd.f32 %v2132_v13, %v975_v38 }
 0x42a   :  { %1203 = vmatprep.mubr.bf16.mxu0 %v1968_v0  ;;  %v1732_v33 = vpop.f32.mrf.mxu0 }
 0x42b   :  { %v997_v10 = vadd.f32 %v2132_v13, %v973_v50  ;;  %v1015_v3 = vmax.f32 %v999_v41, 0.0  ;;  %v978_v61 = vadd.f32 %v1732_v33, %v2115_v54 }
 0x42c   :  { %v937_v37 = vpop.f32.mrf.mxu0 }
 0x42d   :  { %v1013_v39 = vmax.f32 %v997_v10, 0.0  ;;  %v976_v18 = vadd.f32 %v937_v37, %v2111_v20  ;;  %v1059_v47 = vpack.c.bf16 %v1015_v3, %v1014_v1  ;;  %v1002_v2 = vadd.f32 %v2132_v13, %v978_v61  ;;  %v1868_v61 = vld [vmem:[#allocation3 + $0x8] sm:$0xff]  }
 0x42e   :  { %v1733_v60 = vpop.f32.mrf.mxu0 }
 0x42f   :  { %v1058_v43 = vpack.c.bf16 %v1013_v39, %v1012_v15  ;;  %v1000_v55 = vadd.f32 %v2132_v13, %v976_v18  ;;  %v979_v57 = vadd.f32 %v1733_v60, %v2117_v25  ;;  %v1018_v9 = vmax.f32 %v1002_v2, 0.0  ;;  %v1873_v2 = vld [vmem:[#allocation3 + $0x30] sm:$0xff]  }
 0x430   :  { %v940_v49 = vpop.f32.mrf.mxu0 }
 0x431   :  { %1204 = vmatmul.mubr.bf16.gmra.mxu0 %v1057_v36  ;;  %v977_v46 = vadd.f32 %v940_v49, %v2113_v22  ;;  %v1016_v22 = vmax.f32 %v1000_v55, 0.0  ;;  %v1003_v5 = vadd.f32 %v2132_v13, %v979_v57 }
 0x432   :  { %1213 = vmatprep.mubr.bf16.mxu0 %v1968_v0  ;;  %v1736_v48 = vpop.f32.mrf.mxu0 }
 0x433   :  { %v1001_v51 = vadd.f32 %v2132_v13, %v977_v46  ;;  %v1019_v42 = vmax.f32 %v1003_v5, 0.0  ;;  %v982_v16 = vadd.f32 %v1736_v48, %v2123_v30  ;;  %v1870_v5 = vld [vmem:[#allocation3 + $0x18] sm:$0xff]  }
 0x434   :  { %v953_v53 = vpop.f32.mrf.mxu0 }
 0x435   :  { %v1017_v59 = vmax.f32 %v1001_v51, 0.0  ;;  %v980_v25 = vadd.f32 %v953_v53, %v2119_v26  ;;  %v1061_v12 = vpack.c.bf16 %v1019_v42, %v1018_v9  ;;  %v1006_v21 = vadd.f32 %v2132_v13, %v982_v16  ;;  %v1874_v42 = vld [vmem:[#allocation3 + $0x38] sm:$0xff]   ;;  %v2207_v9 = vld [vmem:[%s2250_s3 + $0x2] ss:$0 sm:$0xff]  ;;  %s1969_s3 = smov [#allocation9]  }
 0x436   :  { %v1737_v7 = vpop.f32.mrf.mxu0  ;;  %s1536_s11 = sshll.u32 %s1969_s3, 4  ;;  %s1537_s11 = int_to_ptr.vmem [resolvable:$true] %s1536_s11 }
 0x437   :  { %v1060_v63 = vpack.c.bf16 %v1017_v59, %v1016_v22  ;;  %v1004_v54 = vadd.f32 %v2132_v13, %v980_v25  ;;  %v983_v44 = vadd.f32 %v1737_v7, %v2125_v31  ;;  %v1022_v23 = vmax.f32 %v1006_v21, 0.0  ;;  %v1869_v22 = vld [vmem:[#allocation3 + $0x10] sm:$0xff]   ;;  %s1935_s12 = scalar_lea.vmem %s1537_s11, 2048  ;;  %p1940_p2 = scmp.lt.s32.totalorder %s1537_s11, %s1537_s11 }
 0x438   :  { %v956_v20 = vpop.f32.mrf.mxu0  ;;  %p1936_p1 = scmp.ne.s32.totalorder %s1537_s11, %s1935_s12  ;;  %p1941_p3 = scmp.lt.s32.totalorder %s1935_s12, %s1935_s12 }
 0x439   :  { %1214 = vmatmul.mubr.bf16.gmra.mxu0 %v1058_v43  ;;  %v981_v11 = vadd.f32 %v956_v20, %v2121_v28  ;;  %v1020_v17 = vmax.f32 %v1004_v54, 0.0  ;;  %v1007_v19 = vadd.f32 %v2132_v13, %v983_v44  ;;  %v1872_v20 = vld [vmem:[#allocation3 + $0x28] sm:$0xff]  }
 0x43a   :  { %1223 = vmatprep.mubr.bf16.mxu0 %v1968_v0  ;;  %p1942_p4 = por %p1941_p3, %p1940_p2 }
 0x43b   :  { %v1005_v8 = vadd.f32 %v2132_v13, %v981_v11  ;;  %v1023_v26 = vmax.f32 %v1007_v19, 0.0 }
 0x43c   :  { %p1943_p5 = pnand %p1942_p4, %p1936_p1 }
 0x43d   :  { %v1021_v14 = vmax.f32 %v1005_v8, 0.0  ;;  %v1063_v24 = vpack.c.bf16 %v1023_v26, %v1022_v23 }
 0x43f   :  { %v1062_v28 = vpack.c.bf16 %v1021_v14, %v1020_v17 }
 0x441   :  { %1224 = vmatmul.mubr.bf16.gmra.mxu0 %v1059_v47 }
 0x442   :  { %1233 = vmatprep.mubr.bf16.mxu0 %v1968_v0 }
 0x449   :  { %1234 = vmatmul.mubr.bf16.gmra.mxu0 %v1060_v63  ;;  %v1871_v63 = vld [vmem:[#allocation3 + $0x20] sm:$0xff]  }
 0x44a   :  { %1243 = vmatprep.mubr.bf16.mxu0 %v1968_v0 }
 0x451   :  { %1244 = vmatmul.mubr.bf16.gmra.mxu0 %v1061_v12 }
 0x452   :  { %1253 = vmatprep.mubr.bf16.mxu0 %v1968_v0 }
 0x459   :  { %1254 = vmatmul.mubr.bf16.gmra.mxu0 %v1062_v28 }
 0x45a   :  { %1263 = vmatprep.mubr.bf16.mxu0 %v1968_v0 }
 0x461   :  { %1264 = vmatmul.mubr.bf16.gmra.mxu0 %v1063_v24 }
 0x4e9   :  { %v2172_v52 = vpop.f32.mrf.mxu0 }
 0x4eb   :  { %v1197_v31 = vpop.f32.mrf.mxu0 }
 0x4ed   :  { %v2174_v27 = vpop.f32.mrf.mxu0 }
 0x4ef   :  { %v1201_v30 = vpop.f32.mrf.mxu0 }
 0x4f0   :  { %v1274_v29 = vpack.c.bf16 %v1201_v30, %v1197_v31 }
 0x4f1   :  { %v2176_v58 = vpop.f32.mrf.mxu0 }
 0x4f3   :  { %v1207_v56 = vpop.f32.mrf.mxu0 }
 0x4f5   :  { %v2178_v13 = vpop.f32.mrf.mxu0 }
 0x4f7   :  { %v1211_v32 = vpop.f32.mrf.mxu0 }
 0x4f8   :  { %v1275_v0 = vpack.c.bf16 %v1211_v32, %v1207_v56 }
 0x4f9   :  { %v2180_v6 = vpop.f32.mrf.mxu0 }
 0x4fb   :  { %v1217_v50 = vpop.f32.mrf.mxu0 }
 0x4fd   :  { %v2182_v33 = vpop.f32.mrf.mxu0 }
 0x4ff   :  { %v1221_v34 = vpop.f32.mrf.mxu0 }
 0x500   :  { %v1276_v7 = vpack.c.bf16 %v1221_v34, %v1217_v50 }
 0x501   :  { %v2184_v35 = vpop.f32.mrf.mxu0 }
 0x503   :  { %v1227_v10 = vpop.f32.mrf.mxu0 }
 0x505   :  { %v2186_v36 = vpop.f32.mrf.mxu0 }
 0x507   :  { %v1231_v37 = vpop.f32.mrf.mxu0 }
 0x508   :  { %v1277_v59 = vpack.c.bf16 %v1231_v37, %v1227_v10 }
 0x509   :  { %v2188_v62 = vpop.f32.mrf.mxu0 }
 0x50b   :  { %v1237_v38 = vpop.f32.mrf.mxu0 }
 0x50d   :  { %v2190_v39 = vpop.f32.mrf.mxu0 }
 0x50f   :  { %v1241_v60 = vpop.f32.mrf.mxu0 }
 0x510   :  { %v1278_v57 = vpack.c.bf16 %v1241_v60, %v1237_v38 }
 0x511   :  { %v2192_v40 = vpop.f32.mrf.mxu0 }
 0x513   :  { %v1247_v15 = vpop.f32.mrf.mxu0 }
 0x515   :  { %v2194_v41 = vpop.f32.mrf.mxu0 }
 0x517   :  { %v1251_v43 = vpop.f32.mrf.mxu0 }
 0x518   :  { %v1279_v55 = vpack.c.bf16 %v1251_v43, %v1247_v15 }
 0x519   :  { %v2196_v49 = vpop.f32.mrf.mxu0 }
 0x51b   :  { %v1257_v45 = vpop.f32.mrf.mxu0 }
 0x51d   :  { %v2198_v3 = vpop.f32.mrf.mxu0 }
 0x51f   :  { %v1261_v46 = vpop.f32.mrf.mxu0 }
 0x520   :  { %v1280_v53 = vpack.c.bf16 %v1261_v46, %v1257_v45 }
 0x521   :  { %v2200_v48 = vpop.f32.mrf.mxu0 }
 0x523   :  { %v1267_v1 = vpop.f32.mrf.mxu0 }
 0x525   :  { %v2202_v18 = vpop.f32.mrf.mxu0 }
 0x527   :  { %v1271_v51 = vpop.f32.mrf.mxu0 }
 0x528   :  { %v1281_v47 = vpack.c.bf16 %v1271_v51, %v1267_v1 }
 0x52a   :  { %1738 = vmatprep.subr.bf16.mxu1 %v1281_v47 }
 0x52b   :  { %1739 = vmatpush3.bf16.msra.mxu1 %v1281_v47 }
 0x52c   :  { %1740 = vmatprep.subr.bf16.mxu1 %v1280_v53 }
 0x52f   :  { %1741 = vmatpush3.bf16.msra.mxu1 %v1280_v53 }
 0x530   :  { %1742 = vmatprep.subr.bf16.mxu1 %v1279_v55 }
 0x533   :  { %1743 = vmatpush3.bf16.msra.mxu1 %v1279_v55 }
 0x534   :  { %1744 = vmatprep.subr.bf16.mxu1 %v1278_v57 }
 0x537   :  { %1745 = vmatpush3.bf16.msra.mxu1 %v1278_v57 }
 0x538   :  { %1746 = vmatprep.subr.bf16.mxu1 %v1277_v59 }
 0x53b   :  { %1747 = vmatpush3.bf16.msra.mxu1 %v1277_v59 }
 0x53c   :  { %1748 = vmatprep.subr.bf16.mxu1 %v1276_v7 }
 0x53f   :  { %1749 = vmatpush3.bf16.msra.mxu1 %v1276_v7 }
 0x540   :  { %1750 = vmatprep.subr.bf16.mxu1 %v1275_v0 }
 0x543   :  { %1751 = vmatpush3.bf16.msra.mxu1 %v1275_v0 }
 0x544   :  { %1752 = vmatprep.subr.bf16.mxu1 %v1274_v29 }
 0x547   :  { %1753 = vmatpush3.bf16.msra.mxu1 %v1274_v29 }
 0x54a   :  { %1755 = vmatmul.mubr.bf16.vlgmr.msra.gmra.mxu1 %v1868_v61 }
 0x54b   :  { %1758 = vmatprep.mubr.bf16.mxu1 %v1869_v22 }
 0x552   :  { %1759 = vmatmul.mubr.bf16.gmra.mxu1 %v1870_v5 }
 0x553   :  { %1762 = vmatprep.mubr.bf16.mxu1 %v1871_v63 }
 0x55a   :  { %1763 = vmatmul.mubr.bf16.gmra.mxu1 %v1872_v20 }
 0x55b   :  { %1766 = vmatprep.mubr.bf16.mxu1 %v1873_v2 }
 0x562   :  { %1767 = vmatmul.mubr.bf16.gmra.mxu1 %v1874_v42 }
 0x60a   :  { %v1756_v11 = vpop.f32.mrf.mxu1 }
 0x60b   :  { %v1445_v25 = vadd.f32 %v1756_v11, %v2176_v58 }
 0x60c   :  { %v1380_v8 = vpop.f32.mrf.mxu1 }
 0x60d   :  { %v1469_v12 = vadd.f32 %v2207_v9, %v1445_v25  ;;  %v1443_v54 = vadd.f32 %v1380_v8, %v2172_v52 }
 0x60e   :  { %v1757_v44 = vpop.f32.mrf.mxu1 }
 0x60f   :  { %1517 = vst [vmem:[#allocation9 + $0x10] sm:$0xff] %v1469_v12  ;;  %v1467_v14 = vadd.f32 %v2207_v9, %v1443_v54  ;;  %v1446_v16 = vadd.f32 %v1757_v44, %v2178_v13 }
 0x610   :  { %v1383_v17 = vpop.f32.mrf.mxu1 }
 0x611   :  { %1515 = vst [vmem:[#allocation9] sm:$0xff] %v1467_v14  ;;  %v1470_v19 = vadd.f32 %v2207_v9, %v1446_v16  ;;  %v1444_v28 = vadd.f32 %v1383_v17, %v2174_v27 }
 0x612   :  { %v1760_v21 = vpop.f32.mrf.mxu1 }
 0x613   :  { %1518 = vst [vmem:[#allocation9 + $0x18] sm:$0xff] %v1470_v19  ;;  %v1468_v26 = vadd.f32 %v2207_v9, %v1444_v28  ;;  %v1449_v23 = vadd.f32 %v1760_v21, %v2184_v35 }
 0x614   :  { %v1396_v24 = vpop.f32.mrf.mxu1 }
 0x615   :  { %1516 = vst [vmem:[#allocation9 + $0x8] sm:$0xff] %v1468_v26  ;;  %v1473_v4 = vadd.f32 %v2207_v9, %v1449_v23  ;;  %v1447_v52 = vadd.f32 %v1396_v24, %v2180_v6 }
 0x616   :  { %v1761_v31 = vpop.f32.mrf.mxu1 }
 0x617   :  { %1521 = vst [vmem:[#allocation9 + $0x30] sm:$0xff] %v1473_v4  ;;  %v1471_v30 = vadd.f32 %v2207_v9, %v1447_v52  ;;  %v1450_v29 = vadd.f32 %v1761_v31, %v2186_v36 }
 0x618   :  { %v1399_v58 = vpop.f32.mrf.mxu1 }
 0x619   :  { %1519 = vst [vmem:[#allocation9 + $0x20] sm:$0xff] %v1471_v30  ;;  %v1474_v27 = vadd.f32 %v2207_v9, %v1450_v29  ;;  %v1448_v56 = vadd.f32 %v1399_v58, %v2182_v33 }
 0x61a   :  { %v1764_v13 = vpop.f32.mrf.mxu1 }
 0x61b   :  { %1522 = vst [vmem:[#allocation9 + $0x38] sm:$0xff] %v1474_v27  ;;  %v1472_v32 = vadd.f32 %v2207_v9, %v1448_v56  ;;  %v1453_v0 = vadd.f32 %v1764_v13, %v2192_v40 }
 0x61c   :  { %v1412_v50 = vpop.f32.mrf.mxu1 }
 0x61d   :  { %1520 = vst [vmem:[#allocation9 + $0x28] sm:$0xff] %v1472_v32  ;;  %v1477_v6 = vadd.f32 %v2207_v9, %v1453_v0  ;;  %v1451_v34 = vadd.f32 %v1412_v50, %v2188_v62 }
 0x61e   :  { %v1765_v35 = vpop.f32.mrf.mxu1 }
 0x61f   :  { %1525 = vst [vmem:[#allocation9 + $0x50] sm:$0xff] %v1477_v6  ;;  %v1475_v10 = vadd.f32 %v2207_v9, %v1451_v34  ;;  %v1454_v36 = vadd.f32 %v1765_v35, %v2194_v41 }
 0x620   :  { %v1415_v37 = vpop.f32.mrf.mxu1 }
 0x621   :  { %1523 = vst [vmem:[#allocation9 + $0x40] sm:$0xff] %v1475_v10  ;;  %v1478_v33 = vadd.f32 %v2207_v9, %v1454_v36  ;;  %v1452_v38 = vadd.f32 %v1415_v37, %v2190_v39 }
 0x622   :  { %v1768_v60 = vpop.f32.mrf.mxu1 }
 0x623   :  { %1526 = vst [vmem:[#allocation9 + $0x58] sm:$0xff] %v1478_v33  ;;  %v1476_v40 = vadd.f32 %v2207_v9, %v1452_v38  ;;  %v1457_v15 = vadd.f32 %v1768_v60, %v2200_v48 }
 0x624   :  { %v1428_v43 = vpop.f32.mrf.mxu1 }
 0x625   :  { %1524 = vst [vmem:[#allocation9 + $0x48] sm:$0xff] %v1476_v40  ;;  %v1481_v62 = vadd.f32 %v2207_v9, %v1457_v15  ;;  %v1455_v45 = vadd.f32 %v1428_v43, %v2196_v49 }
 0x626   :  { %v1769_v46 = vpop.f32.mrf.mxu1 }
 0x627   :  { %1529 = vst [vmem:[#allocation9 + $0x70] sm:$0xff] %v1481_v62  ;;  %v1479_v41 = vadd.f32 %v2207_v9, %v1455_v45  ;;  %v1458_v1 = vadd.f32 %v1769_v46, %v2202_v18 }
 0x628   :  { %v1431_v51 = vpop.f32.mrf.mxu1 }
 0x629   :  { %1527 = vst [vmem:[#allocation9 + $0x60] sm:$0xff] %v1479_v41  ;;  %v1482_v39 = vadd.f32 %v2207_v9, %v1458_v1  ;;  %v1456_v48 = vadd.f32 %v1431_v51, %v2198_v3 }
 0x62b   :  { %1530 = vst [vmem:[#allocation9 + $0x78] sm:$0xff] %v1482_v39  ;;  %v1480_v47 = vadd.f32 %v2207_v9, %v1456_v48 }
 0x62d   :  { %1528 = vst [vmem:[#allocation9 + $0x68] sm:$0xff] %v1480_v47 }
 0x62e   :  { %1946 = shalt.err (!%p1943_p5)
}
 0x62f   :  { %1542 = dma.vmem_to_hbm [thread:$0]  %s1537_s11, 2048, %s2251_s4, [#allocation5], %s1962_s18, %s1962_s18, %s1963_s19  }
 0x630   :  { %1959 = dma.done.wait [#allocation5], 2048  }
 0x631   :  { %1960 = vsyncadd [#allocation5], 4294965248 }
 0x632   :  { %1546 = vsyncpa [#allocation4], 1 }
 0x633   :  { %1547 = vsyncpa [#allocation7], 1 }
 0x634   :  { %1548 = vsyncpa [#allocation5], 1 }

</bundles_post_ra>
